<compile_context>
chip_gen: v5e
topology: v5e:2x2
jax: 0.10.0
libtpu: 0.0.40
codegen_flags: <defaults>
</compile_context>

<pallas_src>
import jax
import jax.numpy as jnp
from jax.experimental import pallas as pl
from jax.experimental.pallas import tpu as pltpu

_LANES = 128


def cofragment_kernel(patches_ref, w_ref, cb_ref, head_ref, hb_ref, out_ref):
    """One grid step = one image.

    patches_ref : [HW, 9C]    bf16  im2col patches of this image
    w_ref       : [9C, 2F]    bf16  both experts' conv weights (fused on N)
    cb_ref      : [1, 2F]     f32   both experts' conv biases
    head_ref    : [1, 2F]     f32   concat(h1, h2) / (2*HW)  (pool + ensemble
                                    mean folded in)
    hb_ref      : [1, 1]      f32   (hb1 + hb2) / 2
    out_ref     : [1, 1, 128] f32   lane-broadcast scalar output
    """
    # Fused conv for both experts: single MXU matmul with N = 2F.
    y = jnp.dot(patches_ref[...], w_ref[...],
                preferred_element_type=jnp.float32)           # [HW, 2F] f32
    y = jnp.maximum(y + cb_ref[...], 0.0)                     # bias + ReLU

    # Global average pool = sublane reduction in VMEM (no pooling matmul,
    # no extra HBM input stream).  1/HW is folded into head_ref.
    sums = jnp.sum(y, axis=0, keepdims=True)                  # [1, 2F]

    # Heads + ensemble mean as one lane-axis reduction.
    val = jnp.sum(sums * head_ref[...], axis=1, keepdims=True) + hb_ref[...]

    # Lane-dense store; wrapper slices lane 0.
    out_ref[...] = jnp.broadcast_to(val.reshape(1, 1, 1), (1, 1, _LANES))


def _im2col(x):
    """x: [B, C, H, W] -> patches [B*H*W, C*9] for a 3x3 conv, padding=1."""
    B, C, H, W = x.shape
    xp = jnp.pad(x, ((0, 0), (0, 0), (1, 1), (1, 1)))
    cols = []
    for dy in range(3):
        for dx in range(3):
            cols.append(xp[:, :, dy:dy + H, dx:dx + W])       # [B, C, H, W]
    patches = jnp.concatenate(cols, axis=1)                   # [B, 9C, H, W]
    patches = jnp.transpose(patches, (0, 2, 3, 1))            # [B, H, W, 9C]
    return patches.reshape(B * H * W, 9 * C)


def cofragment_forward(x, params):
    """x: [B, C, H, W] float32.  params: dict of the two experts' weights."""
    B, C, H, W = x.shape
    HW = H * W
    K = 9 * C
    assert HW % 16 == 0, "per-image row tile must be sublane-aligned for bf16"

    def wflat(wc):   # [F, C, 3, 3] -> [9C, F] matching _im2col ordering
        return jnp.transpose(wc, (2, 3, 1, 0)).reshape(K, -1)

    # Fuse both experts along the conv-output dim: [9C, 2F], bf16 for the MXU.
    w12 = jnp.concatenate([wflat(params["w1c"]), wflat(params["w2c"])],
                          axis=1).astype(jnp.bfloat16)
    F2 = w12.shape[1]
    cb12 = jnp.concatenate([params["b1"], params["b2"]]).reshape(1, F2)
    cb12 = cb12.astype(jnp.float32)

    # Fold avg-pool (1/HW) and ensemble mean (0.5) into the head row-vector.
    head = (jnp.concatenate([params["h1"], params["h2"]], axis=0)
            .reshape(1, F2).astype(jnp.float32)) / (2.0 * HW)
    hb = ((params["hb1"] + params["hb2"]) * 0.5).reshape(1, 1).astype(jnp.float32)

    # im2col patches in bf16 (halves HBM bytes of the only large operand).
    # TODO(synk): for large B/C/H build the 9 shifted patch contributions
    # in-kernel (pltpu.roll over a padded NHWC block) instead of materializing
    # the 9x im2col expansion in HBM.
    patches = _im2col(x).astype(jnp.bfloat16)                 # [B*HW, 9C]

    out_padded = pl.pallas_call(
        cofragment_kernel,
        out_shape=jax.ShapeDtypeStruct((B, 1, _LANES), jnp.float32),
        grid=(B,),  # one image per step; pooling stays block-local
        in_specs=[
            pl.BlockSpec((HW, K), lambda b: (b, 0)),          # patches (per image)
            pl.BlockSpec((K, F2), lambda b: (0, 0)),          # fused conv weights
            pl.BlockSpec((1, F2), lambda b: (0, 0)),          # fused conv bias
            pl.BlockSpec((1, F2), lambda b: (0, 0)),          # fused head row
            pl.BlockSpec((1, 1), lambda b: (0, 0)),           # fused head bias
        ],
        out_specs=pl.BlockSpec((1, 1, _LANES), lambda b: (b, 0, 0)),
        compiler_params=pltpu.CompilerParams(
            dimension_semantics=("parallel",)),               # dual-TC on v7x
    )(patches, w12, cb12, head, hb)

    return out_padded[:, :, 0]                                # [B, 1]


def cofragment_reference(x, params):
    """Plain-JAX (f32) reference matching the PyTorch forward semantics."""
    def base(wc, b, h, hb):
        y = jax.lax.conv_general_dilated(
            x, wc, window_strides=(1, 1), padding="SAME",
            dimension_numbers=("NCHW", "OIHW", "NCHW"))       # [B, F, H, W]
        y = jnp.maximum(y + b.reshape(1, -1, 1, 1), 0.0)
        pooled = jnp.mean(y, axis=(2, 3))                     # [B, F]
        return pooled @ h + hb.reshape(1, 1)                  # [B, 1]

    y1 = base(params["w1c"], params["b1"], params["h1"], params["hb1"])
    y2 = base(params["w2c"], params["b2"], params["h2"], params["hb2"])
    return jnp.mean(jnp.concatenate([y1, y2], axis=1), axis=1, keepdims=True)


if __name__ == "__main__":
    B, C, H, W = 2, 4, 16, 16     # small shapes consistent with an image input
    F = 8                          # conv filters in each synthetic expert

    key = jax.random.PRNGKey(0)
    ks = jax.random.split(key, 9)
    x = jax.random.normal(ks[0], (B, C, H, W), dtype=jnp.float32)

    params = dict(
        w1c=0.1 * jax.random.normal(ks[1], (F, C, 3, 3), dtype=jnp.float32),
        b1=0.1 * jax.random.normal(ks[2], (F,), dtype=jnp.float32),
        h1=0.1 * jax.random.normal(ks[3], (F, 1), dtype=jnp.float32),
        hb1=0.1 * jax.random.normal(ks[4], (1,), dtype=jnp.float32),
        w2c=0.1 * jax.random.normal(ks[5], (F, C, 3, 3), dtype=jnp.float32),
        b2=0.1 * jax.random.normal(ks[6], (F,), dtype=jnp.float32),
        h2=0.1 * jax.random.normal(ks[7], (F, 1), dtype=jnp.float32),
        hb2=0.1 * jax.random.normal(ks[8], (1,), dtype=jnp.float32),
    )

    out = jax.block_until_ready(cofragment_forward(x, params))
    ref = jax.block_until_ready(cofragment_reference(x, params))

    assert out.shape == (B, 1), out.shape
    # bf16 inputs / f32 accumulation -> relax tolerance slightly vs pure f32.
    assert jnp.allclose(out, ref, rtol=1e-2, atol=1e-2), (out, ref)

    # TODO(synk): training-time methods (learn / loss_coteach) are optimizer /
    # data-loader logic, not a forward pass, and are intentionally not kernels.
    # TODO(synk): the 'ce' classification branch uses a ResNet expert and only
    # returns base1(x); it is not modeled by this synthetic regressor kernel.
    print("KERNEL_OK")
</pallas_src>

<mosaic_0001>
module attributes {stable_mosaic.version = 11 : i64} {
  func.func @cofragment_kernel(%arg0: i32, %arg1: memref<256x36xbf16, #tpu.memory_space<vmem>>, %arg2: memref<36x16xbf16, #tpu.memory_space<vmem>>, %arg3: memref<1x16xf32, #tpu.memory_space<vmem>>, %arg4: memref<1x16xf32, #tpu.memory_space<vmem>>, %arg5: memref<1x1xf32, #tpu.memory_space<vmem>>, %arg6: memref<1x1x128xf32, #tpu.memory_space<vmem>>) attributes {dimension_semantics = [#tpu.dimension_semantics<parallel>], iteration_bounds = array<i64: 2>, scalar_prefetch = 0 : i64, scratch_operands = 0 : i64, tpu.core_type = #tpu.core_type<tc>, window_params = [{transform_indices = @transform_0, window_bounds = array<i64: 256, 36>}, {pipeline_mode = #tpu.pipeline_mode<synchronous>, transform_indices = @transform_1, window_bounds = array<i64: 36, 16>}, {pipeline_mode = #tpu.pipeline_mode<synchronous>, transform_indices = @transform_2, window_bounds = array<i64: 1, 16>}, {pipeline_mode = #tpu.pipeline_mode<synchronous>, transform_indices = @transform_3, window_bounds = array<i64: 1, 16>}, {pipeline_mode = #tpu.pipeline_mode<synchronous>, transform_indices = @transform_4, window_bounds = array<i64: 1, 1>}, {transform_indices = @transform_5, window_bounds = array<i64: 1, 1, 128>}]} {
    %c0 = arith.constant 0 : index
    %c0_0 = arith.constant 0 : index
    %0 = vector.load %arg1[%c0, %c0_0] : memref<256x36xbf16, #tpu.memory_space<vmem>>, vector<256x36xbf16>
    %c0_1 = arith.constant 0 : index
    %c0_2 = arith.constant 0 : index
    %1 = vector.load %arg2[%c0_1, %c0_2] : memref<36x16xbf16, #tpu.memory_space<vmem>>, vector<36x16xbf16>
    %cst = arith.constant dense<0.000000e+00> : vector<256x16xf32>
    %2 = tpu.matmul %0, %1, %cst {dimension_numbers = #tpu.dot_dimension_numbers<[1], [0], [0], [1], [0, 0, 1, 1], [], []>} : vector<256x36xbf16>, vector<36x16xbf16>, vector<256x16xf32> -> vector<256x16xf32>
    %c0_3 = arith.constant 0 : index
    %c0_4 = arith.constant 0 : index
    %3 = vector.load %arg3[%c0_3, %c0_4] : memref<1x16xf32, #tpu.memory_space<vmem>>, vector<1x16xf32>
    %4 = vector.broadcast %3 : vector<1x16xf32> to vector<256x16xf32>
    %5 = arith.addf %2, %4 : vector<256x16xf32>
    %cst_5 = arith.constant 0.000000e+00 : f32
    %6 = vector.broadcast %cst_5 : f32 to vector<256x16xf32>
    %7 = arith.maximumf %5, %6 : vector<256x16xf32>
    %cst_6 = arith.constant dense<0.000000e+00> : vector<16xf32>
    %8 = vector.multi_reduction <add>, %7, %cst_6 [0] : vector<256x16xf32> to vector<16xf32>
    %9 = vector.shape_cast %8 : vector<16xf32> to vector<1x16xf32>
    %c0_7 = arith.constant 0 : index
    %c0_8 = arith.constant 0 : index
    %10 = vector.load %arg4[%c0_7, %c0_8] : memref<1x16xf32, #tpu.memory_space<vmem>>, vector<1x16xf32>
    %11 = arith.mulf %9, %10 : vector<1x16xf32>
    %cst_9 = arith.constant dense<0.000000e+00> : vector<1xf32>
    %12 = vector.multi_reduction <add>, %11, %cst_9 [1] : vector<1x16xf32> to vector<1xf32>
    %13 = vector.shape_cast %12 : vector<1xf32> to vector<1x1xf32>
    %c0_10 = arith.constant 0 : index
    %c0_11 = arith.constant 0 : index
    %14 = vector.load %arg5[%c0_10, %c0_11] : memref<1x1xf32, #tpu.memory_space<vmem>>, vector<1x1xf32>
    %15 = arith.addf %13, %14 : vector<1x1xf32>
    %16 = vector.shape_cast %15 : vector<1x1xf32> to vector<1x1x1xf32>
    %17 = vector.shape_cast %16 : vector<1x1x1xf32> to vector<1x1x1xf32>
    %18 = vector.broadcast %17 : vector<1x1x1xf32> to vector<1x1x128xf32>
    %c0_12 = arith.constant 0 : index
    %c0_13 = arith.constant 0 : index
    %c0_14 = arith.constant 0 : index
    %19 = vector.load %arg6[%c0_12, %c0_13, %c0_14] : memref<1x1x128xf32, #tpu.memory_space<vmem>>, vector<1x1x128xf32>
    tpu.vector_store %arg6[%c0_12, %c0_13, %c0_14], %18 {strides = array<i32>} : memref<1x1x128xf32, #tpu.memory_space<vmem>>, vector<1x1x128xf32>,
    return
  }
  func.func @transform_0(%arg0: i32) -> (i32, i32) {
    %c0_i32 = arith.constant 0 : i32
    %c0_i32_0 = arith.constant 0 : i32
    return %arg0, %c0_i32 : i32, i32
  }
  func.func @transform_1(%arg0: i32) -> (i32, i32) {
    %c0_i32 = arith.constant 0 : i32
    %c0_i32_0 = arith.constant 0 : i32
    %c0_i32_1 = arith.constant 0 : i32
    return %c0_i32, %c0_i32_0 : i32, i32
  }
  func.func @transform_2(%arg0: i32) -> (i32, i32) {
    %c0_i32 = arith.constant 0 : i32
    %c0_i32_0 = arith.constant 0 : i32
    %c0_i32_1 = arith.constant 0 : i32
    return %c0_i32, %c0_i32_0 : i32, i32
  }
  func.func @transform_3(%arg0: i32) -> (i32, i32) {
    %c0_i32 = arith.constant 0 : i32
    %c0_i32_0 = arith.constant 0 : i32
    %c0_i32_1 = arith.constant 0 : i32
    return %c0_i32, %c0_i32_0 : i32, i32
  }
  func.func @transform_4(%arg0: i32) -> (i32, i32) {
    %c0_i32 = arith.constant 0 : i32
    %c0_i32_0 = arith.constant 0 : i32
    %c0_i32_1 = arith.constant 0 : i32
    return %c0_i32, %c0_i32_0 : i32, i32
  }
  func.func @transform_5(%arg0: i32) -> (i32, i32, i32) {
    %c0_i32 = arith.constant 0 : i32
    %c0_i32_0 = arith.constant 0 : i32
    %c0_i32_1 = arith.constant 0 : i32
    return %arg0, %c0_i32, %c0_i32_0 : i32, i32, i32
  }
}

</mosaic_0001>

<bundles_post_ra>
// kernel: tpu_custom_call.1
= control target key start
LH: loop header
LB: loop body
LE: loop exit
PB: predicated region body
PF: predicated region fallthrough
CT: control target
= control target key end

     0   :  { %s1175_s0 = inlined_call_operand.vmem [shape: bf16[512,36], index: 0, kind: input, shape index: {}]   ;;  %s1176_s1 = inlined_call_operand.vmem [shape: bf16[36,16], index: 1, kind: input, shape index: {}]   ;;  %s1177_s2 = inlined_call_operand.vmem [shape: f32[1,16], index: 2, kind: input, shape index: {}]   ;;  %s1178_s3 = inlined_call_operand.vmem [shape: f32[1,16], index: 3, kind: input, shape index: {}]   ;;  %s1179_s4 = inlined_call_operand.<no memory space> [shape: f32[1,1], index: 4, kind: input, shape index: {}]   ;;  %s1180_s5 = inlined_call_operand.hbm [shape: f32[2,1,128], index: 5, kind: output, shape index: {}]  }
   0x1   :  { %v10_v0 = vstv %s1179_s4 }
   0x2   :  { %11 = vst [vmem:[#allocation2] sm:$0x1] %v10_v0 }
   0x3   :  { %12 = vsyncpa [#allocation4], 0 }
   0x4   :  { %14 = vsyncpa [#allocation4 + $0x1], 0  ;;  %s952_s20 = smov 0   ;;  %s954_s21 = smov 0  }
   0x5   :  { %s956_s22 = smov 0   ;;  %s958_s23 = smov 0  }
   0x6 LB: > { %s973_s4 = sadd.s32 4294967295, %s916_s23   ;;  %s689_s24 = sadd.s32 4294967294, %s916_s23   ;;  %s916_s23 = sphi %s958_s23, %s1186_s23   ;;  %s912_s22 = sphi %s956_s22, %s1185_s22   ;;  %s908_s21 = sphi %s954_s21, %s1184_s21   ;;  %s904_s20 = sphi %s952_s20, %s1183_s20  }
   0x7   : > { %s977_s25 = sadd.s32 1, %s916_s23   ;;  %s137_s26 = sadd.s32 1, %s912_s22 }
   0x8   : > { %s134_s27 = ssub.s32 %s916_s23, %s977_s25  ;;  %p147_p0 = scmp.ne.s32.totalorder %s912_s22, %s908_s21 }
   0x9   : > { %p135_p1 = scmp.eq.s32.totalorder %s134_s27, 0  ;;  %p148_p2 = scmp.eq.s32.totalorder %s973_s4, 1 }
   0xa   : > { %p153_p3 = scmp.ne.s32.totalorder %s908_s21, %s904_s20  ;;  %p154_p4 = scmp.eq.s32.totalorder %s689_s24, 1 }
   0xb   : > { %s988_s28 = scalar_select %p135_p1, %s912_s22, %s137_s26  }
   0xc   : > { %p990_p5 = por %p148_p2, %p147_p0  ;;  %p994_p6 = por %p154_p4, %p153_p3 }
   0xd   : > { %p692_p7 = scmp.ge.s32.totalorder %s916_s23, 1  ;;  %p193_p8 = scmp.lt.s32.totalorder %s916_s23, 3 }
   0xf   : > { %p194_p9 = pnand %p692_p7, %p193_p8 }
  0x10   : > { %s693_s8 = sshll.u32 (!%p194_p9), %s973_s4, 5  ;;  %s218_s26 = sand.u32 (!%p194_p9), 1, %s908_s21  }
  0x11   : > { %197 = sbr.rel (%p194_p9) target bundleno = 527 (0x20f), region = 40  ;;  %p221_p10 = scmp.lt.s32.totalorder (!%p194_p9), %s693_s8, 63 }
  0x12   : > { %s630_s7 = scalar_lea.hbm (!%p194_p9), %s1180_s5, %s973_s4 }
  0x13   : > { %s634_s10 = sshll.u32 (!%p194_p9), %s630_s7, 4  ;;  %s635_s10 = int_to_ptr.hbm [resolvable:$true] %s634_s10 }
  0x14   : > { %s868_s12 = sshra.s32 (!%p194_p9), %s635_s10, 4  ;;  %s869_s12 = int_to_ptr.hbm [resolvable:$true] %s868_s12 }
  0x15   : > { %s870_s13 = scalar_lea.hbm (!%p194_p9), %s869_s12, 1  ;;  %p875_p0 = scmp.lt.s32.totalorder (!%p194_p9), %s869_s12, %s1180_s5 }
  0x16   : > { %v263_v1 = vld [vmem:[%s1176_s1 + $0x10] sm:$0x3]  ;;  %vm412_vm0 = vcmask 1041408   ;;  %s1188_s8 = smov (!%p221_p10, %s693_s8), 63  ;;  %v802_v5 = vld [vmem:[%s1176_s1 + $0x8] sm:$0xff]  ;;  %v801_v6 = vld [vmem:[%s1176_s1] sm:$0xff]  ;;  %p871_p11 = scmp.ne.s32.totalorder %s869_s12, %s870_s13 }
  0x17   : > { %v357_v2 = vunpack.c.l.b16 %v263_v1  ;;  %s694_s11 = sshll.u32 %s1188_s8, 2  ;;  %vm363_vm1 = vcmask 293888   ;;  %v1058_v37 = vld [vmem:[%s1177_s2] ss:$0 sm:$0xff]  ;;  %vm537_vm2 = vcmask 130048   ;;  %vm609_vm3 = vcmask 122880  }
  0x18   : > { %s1013_s16 = scalar_lea.vmem %s1175_s0, %s694_s11  ;;  %s219_s8 = scalar_lea.vmem [#allocation3], %s218_s26 }
  0x19   : > { %v360_v3 = vpack.c.b16 %v357_v2, %v357_v2  ;;  %v785_v7 = vld [vmem:[%s1013_s16] sm:$0xff]  ;;  %v786_v11 = vld [vmem:[%s1013_s16 + $0x8] sm:$0xff]  ;;  %v787_v15 = vld [vmem:[%s1013_s16 + $0x10] sm:$0xff]  ;;  %s632_s9 = sshll.u32 %s219_s8, 4  ;;  %s622_s11 = scalar_lea.sflag [#allocation4], %s218_s26  ;;  %s633_s9 = int_to_ptr.vmem [resolvable:$true] %s632_s9 }
  0x1a   : > { %v789_v8 = vld [vmem:[%s1013_s16 + $0x20] sm:$0xff]  ;;  %v790_v12 = vld [vmem:[%s1013_s16 + $0x28] sm:$0xff]  ;;  %v791_v16 = vld [vmem:[%s1013_s16 + $0x30] sm:$0xff]  ;;  %p872_p12 = pnand %p871_p11, %p990_p5 }
  0x1b   : > { %v414_v4 = vsel %vm412_vm0, %v360_v3, 0  ;;  %v793_v9 = vld [vmem:[%s1013_s16 + $0x40] sm:$0xff]  ;;  %v794_v13 = vld [vmem:[%s1013_s16 + $0x48] sm:$0xff]  ;;  %v795_v17 = vld [vmem:[%s1013_s16 + $0x50] sm:$0xff] }
  0x1c   : > { %421 = vmatpush.bf16.msra.mxu0 %v414_v4  ;;  %803 = vmatpush.bf16.msra.mxu1 %v414_v4  ;;  %v797_v10 = vld [vmem:[%s1013_s16 + $0x60] sm:$0xff]  ;;  %v798_v14 = vld [vmem:[%s1013_s16 + $0x68] sm:$0xff]  ;;  %v799_v18 = vld [vmem:[%s1013_s16 + $0x70] sm:$0xff]  ;;  %p873_p13 = pneg %p872_p12 }
  0x1d   : > { %804 = vmatpush.bf16.msra.mxu2 %v414_v4  ;;  %805 = vmatpush.bf16.msra.mxu3 %v414_v4  ;;  %v788_v19 = vld [vmem:[%s1013_s16 + $0x18] sm:$0xff] }
  0x1e   : > { %v792_v20 = vld [vmem:[%s1013_s16 + $0x38] sm:$0xff] }
  0x1f   : > { %v796_v21 = vld [vmem:[%s1013_s16 + $0x58] sm:$0xff] }
  0x20   : > { %422 = vmatpush.bf16.msra.mxu0 %v802_v5  ;;  %806 = vmatpush.bf16.msra.mxu1 %v802_v5  ;;  %v800_v22 = vld [vmem:[%s1013_s16 + $0x78] sm:$0xff]  ;;  %s874_s16 = scalar_lea.hbm %s1180_s5, 2 }
  0x21   : > { %807 = vmatpush.bf16.msra.mxu2 %v802_v5  ;;  %808 = vmatpush.bf16.msra.mxu3 %v802_v5  ;;  %p876_p1 = scmp.lt.s32.totalorder %s874_s16, %s870_s13 }
  0x23   : > { %p877_p2 = por %p876_p1, %p875_p0 }
  0x24   : > { %423 = vmatpush.bf16.msra.mxu0 %v801_v6  ;;  %809 = vmatpush.bf16.msra.mxu1 %v801_v6 }
  0x25   : > { %810 = vmatpush.bf16.msra.mxu2 %v801_v6  ;;  %811 = vmatpush.bf16.msra.mxu3 %v801_v6  ;;  %p878_p3 = pnand %p877_p2, %p873_p13 }
  0x27   : > { %767 = vmatmul.msk.bf16.vlgmr.msra.gmra.mxu0 %vm363_vm1, %v785_v7  ;;  %771 = vmatmul.msk.bf16.vlgmr.msra.gmra.mxu1 %vm363_vm1, %v789_v8 }
  0x28   : > { %775 = vmatmul.msk.bf16.vlgmr.msra.gmra.mxu2 %vm363_vm1, %v793_v9  ;;  %779 = vmatmul.msk.bf16.vlgmr.msra.gmra.mxu3 %vm363_vm1, %v797_v10 }
  0x37   : > { %768 = vmatmul.msk.bf16.gmra.mxu0 %vm363_vm1, %v786_v11  ;;  %772 = vmatmul.msk.bf16.gmra.mxu1 %vm363_vm1, %v790_v12 }
  0x38   : > { %776 = vmatmul.msk.bf16.gmra.mxu2 %vm363_vm1, %v794_v13  ;;  %780 = vmatmul.msk.bf16.gmra.mxu3 %vm363_vm1, %v798_v14 }
  0x47   : > { %769 = vmatmul.msk.bf16.gmra.mxu0 %vm363_vm1, %v787_v15  ;;  %773 = vmatmul.msk.bf16.gmra.mxu1 %vm363_vm1, %v791_v16 }
  0x48   : > { %777 = vmatmul.msk.bf16.gmra.mxu2 %vm363_vm1, %v795_v17  ;;  %781 = vmatmul.msk.bf16.gmra.mxu3 %vm363_vm1, %v799_v18 }
  0x57   : > { %770 = vmatmul.msk.bf16.gmra.mxu0 %vm363_vm1, %v788_v19  ;;  %774 = vmatmul.msk.bf16.gmra.mxu1 %vm363_vm1, %v792_v20 }
  0x58   : > { %778 = vmatmul.msk.bf16.gmra.mxu2 %vm363_vm1, %v796_v21  ;;  %782 = vmatmul.msk.bf16.gmra.mxu3 %vm363_vm1, %v800_v22 }
  0xa4   : > { %v425_v23 = vpop.f32.mrf.mxu0  ;;  %v445_v24 = vpop.f32.mrf.mxu1 }
  0xa5   : > { %v426_v41 = vadd.f32 %v1058_v37, %v425_v23  ;;  %v446_v3 = vadd.f32 %v1058_v37, %v445_v24 }
  0xa7   : > { %v505_v46 = vmax.f32 %v426_v41, 0.0  ;;  %v513_v13 = vmax.f32 %v446_v3, 0.0 }
  0xa9   : > { %v538_v55 = vsel %vm537_vm2, %v505_v46, 0.0  ;;  %v553_v22 = vsel %vm537_vm2, %v513_v13, 0.0 }
  0xab   : > { %v1047_v27 = vpop.f32.mrf.mxu2  ;;  %v1051_v33 = vpop.f32.mrf.mxu3 }
  0xac   : > { %v427_v25 = vpop.f32.mrf.mxu0  ;;  %v447_v26 = vpop.f32.mrf.mxu1 }
  0xad   : > { %v428_v39 = vadd.f32 %v1058_v37, %v427_v25  ;;  %v448_v8 = vadd.f32 %v1058_v37, %v447_v26 }
  0xaf   : > { %v506_v44 = vmax.f32 %v428_v39, 0.0  ;;  %v514_v17 = vmax.f32 %v448_v8, 0.0 }
  0xb1   : > { %v539_v50 = vsel %vm537_vm2, %v506_v44, 0.0  ;;  %v555_v26 = vsel %vm537_vm2, %v514_v17, 0.0 }
  0xb2   : > { %v540_v59 = vadd.f32 %v539_v50, %v538_v55 }
  0xb3   : > { %v1049_v30 = vpop.f32.mrf.mxu2  ;;  %v1060_v38 = vpop.f32.mrf.mxu3 }
  0xb4   : > { %v430_v28 = vpop.f32.mrf.mxu0  ;;  %v450_v29 = vpop.f32.mrf.mxu1 }
  0xb5   : > { %v431_v42 = vadd.f32 %v1058_v37, %v430_v28  ;;  %v451_v14 = vadd.f32 %v1058_v37, %v450_v29 }
  0xb7   : > { %v507_v47 = vmax.f32 %v431_v42, 0.0  ;;  %v515_v23 = vmax.f32 %v451_v14, 0.0 }
  0xb9   : > { %v541_v56 = vsel %vm537_vm2, %v507_v47, 0.0  ;;  %v557_v39 = vsel %vm537_vm2, %v515_v23, 0.0  ;;  %v466_v47 = vadd.f32 %v1058_v37, %v1047_v27 }
  0xba   : > { %v542_v62 = vadd.f32 %v541_v56, %v540_v59 }
  0xbb   : > { %v1053_v35 = vpop.f32.mrf.mxu2  ;;  %v1071_v54 = vpop.f32.mrf.mxu3 }
  0xbc   : > { %v432_v31 = vpop.f32.mrf.mxu0  ;;  %v452_v32 = vpop.f32.mrf.mxu1 }
  0xbd   : > { %v433_v45 = vadd.f32 %v1058_v37, %v432_v31  ;;  %v453_v18 = vadd.f32 %v1058_v37, %v452_v32 }
  0xbf   : > { %v508_v51 = vmax.f32 %v433_v45, 0.0  ;;  %v516_v28 = vmax.f32 %v453_v18, 0.0 }
  0xc1   : > { %v543_v60 = vsel %vm537_vm2, %v508_v51, 0.0  ;;  %v559_v44 = vsel %vm537_vm2, %v516_v28, 0.0 }
  0xc2   : > { %v544_v2 = vadd.f32 %v543_v60, %v542_v62 }
  0xc3   : > { %v1065_v43 = vpop.f32.mrf.mxu2  ;;  %v1083_v12 = vpop.f32.mrf.mxu3 }
  0xc4   : > { %v435_v34 = vpop.f32.mrf.mxu0  ;;  %v455_v36 = vpop.f32.mrf.mxu1 }
  0xc5   : > { %v436_v48 = vadd.f32 %v1058_v37, %v435_v34  ;;  %v456_v24 = vadd.f32 %v1058_v37, %v455_v36 }
  0xc7   : > { %v509_v57 = vmax.f32 %v436_v48, 0.0  ;;  %v517_v32 = vmax.f32 %v456_v24, 0.0 }
  0xc9   : > { %v545_v0 = vsel %vm537_vm2, %v509_v57, 0.0  ;;  %v561_v48 = vsel %vm537_vm2, %v517_v32, 0.0  ;;  %v521_v57 = vmax.f32 %v466_v47, 0.0 }
  0xca   : > { %v546_v5 = vadd.f32 %v545_v0, %v544_v2 }
  0xcb   : > { %v475_v63 = vpop.f32.mrf.mxu2  ;;  %v495_v42 = vpop.f32.mrf.mxu3 }
  0xcc   : > { %v437_v40 = vpop.f32.mrf.mxu0  ;;  %v457_v49 = vpop.f32.mrf.mxu1  ;;  %v476_v3 = vadd.f32 %v1058_v37, %v475_v63 }
  0xcd   : > { %v438_v52 = vadd.f32 %v1058_v37, %v437_v40  ;;  %v458_v29 = vadd.f32 %v1058_v37, %v457_v49 }
  0xcf   : > { %v510_v61 = vmax.f32 %v438_v52, 0.0  ;;  %v518_v45 = vmax.f32 %v458_v29, 0.0  ;;  %v468_v52 = vadd.f32 %v1058_v37, %v1049_v30  ;;  %v569_v30 = vsel %vm537_vm2, %v521_v57, 0.0 }
  0xd1   : > { %v547_v4 = vsel %vm537_vm2, %v510_v61, 0.0  ;;  %v522_v27 = vmax.f32 %v468_v52, 0.0  ;;  %v473_v61 = vadd.f32 %v1058_v37, %v1065_v43  ;;  %v525_v43 = vmax.f32 %v476_v3, 0.0  ;;  %v607_v3 = vld [vmem:[%s1178_s3] sm:$0x1] }
  0xd2   : > { %v548_v11 = vadd.f32 %v547_v4, %v546_v5 }
  0xd3   : > { %v477_v21 = vpop.f32.mrf.mxu2  ;;  %v571_v5 = vsel %vm537_vm2, %v522_v27, 0.0  ;;  %v577_v17 = vsel %vm537_vm2, %v525_v43, 0.0 }
  0xd4   : > { %v440_v53 = vpop.f32.mrf.mxu0  ;;  %v460_v7 = vpop.f32.mrf.mxu1 }
  0xd5   : > { %v441_v58 = vadd.f32 %v1058_v37, %v440_v53  ;;  %v461_v40 = vadd.f32 %v1058_v37, %v460_v7  ;;  %v563_v53 = vsel %vm537_vm2, %v518_v45, 0.0 }
  0xd7   : > { %v511_v1 = vmax.f32 %v441_v58, 0.0  ;;  %v519_v49 = vmax.f32 %v461_v40, 0.0  ;;  %v471_v58 = vadd.f32 %v1058_v37, %v1053_v35  ;;  %v524_v35 = vmax.f32 %v473_v61, 0.0 }
  0xd8   : > { %v496_v40 = vadd.f32 %v1058_v37, %v495_v42 }
  0xd9   : > { %v549_v9 = vsel %vm537_vm2, %v511_v1, 0.0  ;;  %v565_v59 = vsel %vm537_vm2, %v519_v49, 0.0  ;;  %v497_v1 = vpop.f32.mrf.mxu3  ;;  %v523_v2 = vmax.f32 %v471_v58, 0.0  ;;  %v575_v13 = vsel %vm537_vm2, %v524_v35, 0.0 }
  0xda   : > { %v550_v16 = vadd.f32 %v549_v9, %v548_v11 }
  0xdb   : > { %v480_v51 = vpop.f32.mrf.mxu2  ;;  %v573_v9 = vsel %vm537_vm2, %v523_v2, 0.0 }
  0xdc   : > { %v442_v6 = vpop.f32.mrf.mxu0  ;;  %v462_v34 = vpop.f32.mrf.mxu1 }
  0xdd   : > { %v443_v10 = vadd.f32 %v1058_v37, %v442_v6  ;;  %v463_v36 = vadd.f32 %v1058_v37, %v462_v34  ;;  %v478_v6 = vadd.f32 %v1058_v37, %v477_v21  ;;  %v488_v21 = vadd.f32 %v1058_v37, %v1060_v38 }
  0xdf   : > { %v512_v15 = vmax.f32 %v443_v10, 0.0  ;;  %v520_v55 = vmax.f32 %v463_v36, 0.0  ;;  %v481_v10 = vadd.f32 %v1058_v37, %v480_v51  ;;  %v526_v14 = vmax.f32 %v478_v6, 0.0 }
  0xe0   : > { %v918_v6 = vmov 0  }
  0xe1   : > { %v551_v19 = vsel %vm537_vm2, %v512_v15, 0.0  ;;  %v567_v62 = vsel %vm537_vm2, %v520_v55, 0.0  ;;  %v527_v18 = vmax.f32 %v481_v10, 0.0  ;;  %852 = vset.pattern.permute.xlu0 %v918_v6 }
  0xe2   : > { %v552_v20 = vadd.f32 %v551_v19, %v550_v16  ;;  %v486_v16 = vadd.f32 %v1058_v37, %v1051_v33  ;;  %v530_v33 = vmax.f32 %v488_v21, 0.0 }
  0xe3   : > { %v482_v8 = vpop.f32.mrf.mxu2  ;;  %v581_v28 = vsel %vm537_vm2, %v527_v18, 0.0 }
  0xe4   : > { %v554_v25 = vadd.f32 %v553_v22, %v552_v20  ;;  %v483_v15 = vadd.f32 %v1058_v37, %v482_v8  ;;  %v500_v20 = vpop.f32.mrf.mxu3  ;;  %v579_v22 = vsel %vm537_vm2, %v526_v14, 0.0 }
  0xe6   : > { %v556_v31 = vadd.f32 %v555_v26, %v554_v25  ;;  %v528_v23 = vmax.f32 %v483_v15, 0.0  ;;  %v529_v25 = vmax.f32 %v486_v16, 0.0  ;;  %v491_v26 = vadd.f32 %v1058_v37, %v1071_v54 }
  0xe7   : > { %v498_v54 = vadd.f32 %v1058_v37, %v497_v1 }
  0xe8   : > { %v558_v41 = vadd.f32 %v557_v39, %v556_v31  ;;  %v493_v31 = vadd.f32 %v1058_v37, %v1083_v12  ;;  %v583_v34 = vsel %vm537_vm2, %v528_v23, 0.0  ;;  %v585_v38 = vsel %vm537_vm2, %v529_v25, 0.0 }
  0xe9   : > { %v531_v32 = vmax.f32 %v491_v26, 0.0  ;;  %v501_v12 = vadd.f32 %v1058_v37, %v500_v20  ;;  %v534_v51 = vmax.f32 %v498_v54, 0.0 }
  0xea   : > { %v560_v46 = vadd.f32 %v559_v44, %v558_v41  ;;  %v587_v44 = vsel %vm537_vm2, %v530_v33, 0.0  ;;  %v532_v45 = vmax.f32 %v493_v31, 0.0 }
  0xeb   : > { %v589_v47 = vsel %vm537_vm2, %v531_v32, 0.0  ;;  %v535_v55 = vmax.f32 %v501_v12, 0.0  ;;  %v595_v57 = vsel %vm537_vm2, %v534_v51, 0.0 }
  0xec   : > { %v562_v50 = vadd.f32 %v561_v48, %v560_v46  ;;  %v502_v46 = vpop.f32.mrf.mxu3  ;;  %v533_v48 = vmax.f32 %v496_v40, 0.0 }
  0xed   : > { %v503_v52 = vadd.f32 %v1058_v37, %v502_v46 }
  0xee   : > { %v564_v56 = vadd.f32 %v563_v53, %v562_v50  ;;  %v591_v50 = vsel %vm537_vm2, %v532_v45, 0.0  ;;  %v593_v53 = vsel %vm537_vm2, %v533_v48, 0.0 }
  0xef   : > { %v536_v58 = vmax.f32 %v503_v52, 0.0 }
  0xf0   : > { %v566_v60 = vadd.f32 %v565_v59, %v564_v56 }
  0xf1   : > { %v599_v61 = vsel %vm537_vm2, %v536_v58, 0.0 }
  0xf2   : > { %v568_v0 = vadd.f32 %v567_v62, %v566_v60  ;;  %v597_v60 = vsel %vm537_vm2, %v535_v55, 0.0 }
  0xf4   : > { %v570_v4 = vadd.f32 %v569_v30, %v568_v0 }
  0xf6   : > { %v572_v7 = vadd.f32 %v571_v5, %v570_v4 }
  0xf8   : > { %v574_v11 = vadd.f32 %v573_v9, %v572_v7  ;;  %v613_v7 = vld [vmem:[#allocation2] sm:$0x1] }
  0xfa   : > { %v576_v63 = vadd.f32 %v575_v13, %v574_v11 }
  0xfc   : > { %v578_v19 = vadd.f32 %v577_v17, %v576_v63 }
  0xfe   : > { %v580_v24 = vadd.f32 %v579_v22, %v578_v19 }
 0x100   : > { %v582_v29 = vadd.f32 %v581_v28, %v580_v24 }
 0x102   : > { %v584_v39 = vadd.f32 %v583_v34, %v582_v29 }
 0x104   : > { %v586_v41 = vadd.f32 %v585_v38, %v584_v39 }
 0x106   : > { %v588_v36 = vadd.f32 %v587_v44, %v586_v41 }
 0x108   : > { %v590_v49 = vadd.f32 %v589_v47, %v588_v36 }
 0x10a   : > { %v592_v42 = vadd.f32 %v591_v50, %v590_v49 }
 0x10c   : > { %v594_v56 = vadd.f32 %v593_v53, %v592_v42 }
 0x10e   : > { %v596_v59 = vadd.f32 %v595_v57, %v594_v56 }
 0x110   : > { %v598_v27 = vadd.f32 %v597_v60, %v596_v59 }
 0x112   : > { %v600_v62 = vadd.f32 %v599_v61, %v598_v27 }
 0x114   : > { %v601_v0 = vrot.slane %v600_v62, 4 }
 0x116   : > { %v602_v1 = vadd.f32 %v601_v0, %v600_v62 }
 0x118   : > { %v603_v30 = vrot.slane %v602_v1, 2 }
 0x11a   : > { %v604_v37 = vadd.f32 %v603_v30, %v602_v1 }
 0x11c   : > { %v605_v2 = vrot.slane %v604_v37, 1 }
 0x11e   : > { %v606_v4 = vadd.f32 %v605_v2, %v604_v37 }
 0x120   : > { %v608_v5 = vmul.f32 %v607_v3, %v606_v4 }
 0x122   : > { %v610_v35 = vsel %vm609_vm3, %v608_v5, 0.0 }
 0x123   : > { %611 = vadd.xlane.f32.xlu0 %v610_v35 }
 0x196   : > { %v612_v8 = vpop.xlane.xlu0 %611 }
 0x197   : > { %v614_v9 = vadd.f32 %v613_v7, %v612_v8 }
 0x199   : > { %617 = vperm.xlu0 %852, %v614_v9  }
 0x20b   : > { %v618_v43 = vpop.permute.xlu0 %617 }
 0x20c   : > { %620 = vst [vmem:[%s219_s8] sm:$0x1] %v618_v43 }
 0x20d   : > { %881 = shalt.err (!%p878_p3)
}
 0x20e   : > { %812 = dma.vmem_to_hbm [thread:$0]  (%p990_p5), %s633_s9, 16, %s635_s10, %s622_s11  }
 0x20f PF: > { %p818_p4 = scmp.ge.s32.totalorder %s916_s23, 2  ;;  %s646_s18 = sand.u32 1, %s904_s20  }
 0x210   : > { %s647_s19 = scalar_lea.sflag [#allocation4], %s646_s18 }
 0x211   : > { %p815_p7 = pnand %p818_p4, %p994_p6 }
 0x213   : > { %p816_p8 = pneg %p815_p7 }
 0x215   : > { %899 = dma.done.wait (%p816_p8), %s647_s19, 16  }
 0x216   : > { %901 = vsyncadd (%p816_p8), %s647_s19, 4294967280  ;;  %p17_p9 = scmp.ge.s32.totalorder %s977_s25, 4   ;;  %s1183_s20 = smov %s908_s21 }
 0x217   : > { %s1184_s21 = smov %s912_s22  ;;  %s1185_s22 = smov %s988_s28 }
 0x218   : > { %s1186_s23 = smov %s977_s25  ;;  %19 = sbr.rel (!%p17_p9) target bundleno = 6 (0x6), region = 75 }
 0x21d   :  { %652 = vsyncpa [#allocation4], 1 }
 0x21e   :  { %654 = vsyncpa [#allocation4 + $0x1], 1 }

</bundles_post_ra>
